<compile_context>
chip_gen: v7x
topology: tpu7x:2x2x1
jax: 0.10.0
libtpu: 0.0.40
codegen_flags: <defaults>
</compile_context>

<pallas_src>
import jax
import jax.numpy as jnp
from jax.experimental import pallas as pl
from jax.experimental.pallas import tpu as pltpu

_SMOOTH_NR = 1e-5
_SMOOTH_DR = 1e-5


# ------------------------------ Pallas kernel --------------------------------
def _dice_partials_kernel(p_ref, t_ref, out_ref):
    """Accumulate dice partial sums for a (batch-block, HW-chunk) tile.

    p_ref, t_ref : (Bt, G, Tl) bf16 in VMEM  (stacked prediction / target rows)
    out_ref      : (Bt, 3, G) f32 in VMEM, resident across the HW-chunk axis:
                   [:,0,:] += sum_lane(p*t)   (intersection)
                   [:,1,:] += sum_lane(p)
                   [:,2,:] += sum_lane(t)
    """
    k = pl.program_id(1)

    @pl.when(k == 0)
    def _init():
        out_ref[...] = jnp.zeros_like(out_ref)

    # bf16 in HBM/VMEM, f32 accumulation (also keeps v5e's no-bf16 VALU happy).
    p = p_ref[...].astype(jnp.float32)          # (Bt, G, Tl)
    t = t_ref[...].astype(jnp.float32)

    inter = jnp.sum(p * t, axis=-1)[:, None, :]  # (Bt, 1, G)
    sum_p = jnp.sum(p, axis=-1)[:, None, :]
    sum_t = jnp.sum(t, axis=-1)[:, None, :]

    out_ref[:, 0:1, :] += inter
    out_ref[:, 1:2, :] += sum_p
    out_ref[:, 2:3, :] += sum_t


# ------------------------------ tiling helpers --------------------------------
_VMEM_BUDGET_BYTES = 8 * 1024 * 1024   # per-step, double-buffered; safe on v5e/v6e/v7x


def _choose_lane_tile(hw, cap=8192):
    """Largest multiple-of-128 divisor of HW up to `cap`, or full HW if small."""
    if hw <= cap:
        return hw
    for t in range(cap, 127, -128):
        if hw % t == 0:
            return t
    return hw  # fallback: monolithic block (rare non-128-divisible large HW)


def _choose_batch_tile(b, g, tl):
    """Largest divisor of B whose double-buffered bf16 blocks fit the budget.

    Capped at B//2 when B >= 2 so there are >=2 parallel batch blocks for the
    dual-TensorCore chips (v7x) while still amortizing per-step overhead.
    """
    per_elem = 2 * 2 * g * tl * 2            # 2 inputs * 2 buffers * bf16
    cap = max(1, _VMEM_BUDGET_BYTES // per_elem)
    if b >= 2:
        cap = min(cap, max(1, b // 2))
    bt = 1
    for d in range(1, b + 1):
        if b % d == 0 and d <= cap:
            bt = d
    return bt


# ------------------------------ pallas_call wrapper ---------------------------
def _dice_partial_sums(p_stack, t_stack):
    """p_stack / t_stack: (B, G, HW) bf16.  Returns (B, 3, G) f32 partial sums."""
    B, G, HW = p_stack.shape
    tl = _choose_lane_tile(HW)
    bt = _choose_batch_tile(B, G, tl)
    nb, nk = B // bt, HW // tl

    return pl.pallas_call(
        _dice_partials_kernel,
        out_shape=jax.ShapeDtypeStruct((B, 3, G), jnp.float32),
        grid_spec=pltpu.PrefetchScalarGridSpec(
            num_scalar_prefetch=0,
            grid=(nb, nk),                                   # reduction axis last
            in_specs=[
                pl.BlockSpec((bt, G, tl), lambda b, k: (b, 0, k)),
                pl.BlockSpec((bt, G, tl), lambda b, k: (b, 0, k)),
            ],
            out_specs=pl.BlockSpec((bt, 3, G), lambda b, k: (b, 0, 0)),
        ),
        compiler_params=pltpu.CompilerParams(
            dimension_semantics=("parallel", "arbitrary")),
    )(p_stack, t_stack)


# ------------------------------ warp (wrapper-side) ---------------------------
def _bilinear_warp(seg, disp, H, W):
    """VoxelMorph-style bilinear warp with zero padding, in plain JAX/XLA.

    seg: (B, C, HW) f32; disp: (B, 2, HW) f32 (pixel displacement [dy, dx]).
    O(C*HW) gathers — XLA handles this well; keeping it out of the kernel
    avoids the previous O(HW^2) one-hot matrix entirely.
    """
    B, C, HW = seg.shape
    p = jnp.arange(HW)
    pi = (p // W).astype(jnp.float32)
    pj = (p % W).astype(jnp.float32)
    gy = pi[None, :] + disp[:, 0, :]
    gx = pj[None, :] + disp[:, 1, :]

    y0 = jnp.floor(gy); x0 = jnp.floor(gx); y1 = y0 + 1.0; x1 = x0 + 1.0
    wy1 = gy - y0; wy0 = 1.0 - wy1
    wx1 = gx - x0; wx0 = 1.0 - wx1

    valid = lambda v, up: ((v >= 0.0) & (v <= up)).astype(jnp.float32)
    clampi = lambda v, up: jnp.clip(v, 0.0, up).astype(jnp.int32)
    vy0, vy1 = valid(y0, H - 1.0), valid(y1, H - 1.0)
    vx0, vx1 = valid(x0, W - 1.0), valid(x1, W - 1.0)
    y0i, y1i = clampi(y0, H - 1.0), clampi(y1, H - 1.0)
    x0i, x1i = clampi(x0, W - 1.0), clampi(x1, W - 1.0)

    def gather(yi, xi):
        idx = jnp.broadcast_to((yi * W + xi)[:, None, :], (B, C, HW))
        return jnp.take_along_axis(seg, idx, axis=-1)

    return (gather(y0i, x0i) * (wy0 * wx0 * vy0 * vx0)[:, None, :]
            + gather(y0i, x1i) * (wy0 * wx1 * vy0 * vx1)[:, None, :]
            + gather(y1i, x0i) * (wy1 * wx0 * vy1 * vx0)[:, None, :]
            + gather(y1i, x1i) * (wy1 * wx1 * vy1 * vx1)[:, None, :])


# ------------------------------ public entry point ----------------------------
def seg_loss(pred1, pred2, seg1, seg2, disp, *, lambda_super, lambda_ana):
    """Pallas-backed equivalent of SegLoss.forward (reduction='mean').

    pred*/seg*: (B, C, H, W); disp: (B, 2, H, W).
    """
    B, C, H, W = pred1.shape
    HW = H * W
    f32 = jnp.float32
    rs = lambda x: x.reshape(x.shape[0], x.shape[1], HW).astype(f32)

    p1, p2 = rs(pred1), rs(pred2)
    d = rs(disp)

    # Static (trace-time) gating of supervision terms — unused dice terms are
    # never stacked, DMA'd or reduced.
    if seg1 is not None and seg2 is not None:
        s1, s2 = rs(seg1), rs(seg2)
        super_pairs = [(p1, s1), (p2, s2)]
    elif seg1 is not None:
        s1, s2 = rs(seg1), p2            # seg2 := pred2
        super_pairs = [(p1, s1)]
    else:
        assert seg2 is not None
        s1, s2 = p1, rs(seg2)            # seg1 := pred1
        super_pairs = [(p2, s2)]

    # Anatomy term: warp(seg2, disp) vs seg1.
    # TODO(synk): zero-padding bilinear STN assumed for the undefined self.warp.
    warped = _bilinear_warp(s2, d, H, W)
    pairs = super_pairs + [(warped, s1)]
    n_super = len(super_pairs)
    n_groups = len(pairs)

    # Stack all pairs along the channel axis, dropping the background channel
    # (include_background=False) here — not in the kernel — and casting to bf16.
    p_stack = jnp.concatenate([p[:, 1:, :] for p, _ in pairs],
                              axis=1).astype(jnp.bfloat16)     # (B, G, HW)
    t_stack = jnp.concatenate([t[:, 1:, :] for _, t in pairs],
                              axis=1).astype(jnp.bfloat16)     # (B, G, HW)

    sums = _dice_partial_sums(p_stack, t_stack)                # (B, 3, G) f32
    inter, sum_p, sum_t = sums[:, 0, :], sums[:, 1, :], sums[:, 2, :]
    dice = 1.0 - (2.0 * inter + _SMOOTH_NR) / (sum_p + sum_t + _SMOOTH_DR)
    dice = dice.reshape(B, n_groups, C - 1)
    per_group = jnp.mean(dice, axis=(0, 2))                    # (n_groups,)

    loss_super = jnp.sum(per_group[:n_super])
    loss_ana = per_group[n_super]
    return lambda_super * loss_super + lambda_ana * loss_ana


# ----------------------------- pure-JAX f32 reference --------------------------
def _dice_mean_ref(p, t):
    pf, tf = p[:, 1:, :], t[:, 1:, :]
    inter = jnp.sum(pf * tf, axis=-1)
    denom = jnp.sum(pf, axis=-1) + jnp.sum(tf, axis=-1)
    d = 1.0 - (2.0 * inter + _SMOOTH_NR) / (denom + _SMOOTH_DR)
    return jnp.mean(d)


def _warp_ref(seg, disp, H, W):
    B, C, HW = seg.shape
    p = jnp.arange(HW)
    pi = (p // W).astype(jnp.float32)
    pj = (p % W).astype(jnp.float32)
    gy = pi[None, :] + disp[:, 0, :]
    gx = pj[None, :] + disp[:, 1, :]
    y0 = jnp.floor(gy); x0 = jnp.floor(gx); y1 = y0 + 1.0; x1 = x0 + 1.0
    wy1 = gy - y0; wy0 = 1.0 - wy1; wx1 = gx - x0; wx0 = 1.0 - wx1
    v = lambda a, up: ((a >= 0.0) & (a <= up)).astype(jnp.float32)
    ci = lambda a, up: jnp.clip(a, 0.0, up).astype(jnp.int32)
    vy0, vy1 = v(y0, H - 1.0), v(y1, H - 1.0)
    vx0, vx1 = v(x0, W - 1.0), v(x1, W - 1.0)
    y0i, y1i = ci(y0, H - 1.0), ci(y1, H - 1.0)
    x0i, x1i = ci(x0, W - 1.0), ci(x1, W - 1.0)

    def gather(yi, xi):
        idx = jnp.broadcast_to((yi * W + xi)[:, None, :], (B, C, HW))
        return jnp.take_along_axis(seg, idx, axis=-1)

    return (gather(y0i, x0i) * (wy0 * wx0 * vy0 * vx0)[:, None, :]
            + gather(y0i, x1i) * (wy0 * wx1 * vy0 * vx1)[:, None, :]
            + gather(y1i, x0i) * (wy1 * wx0 * vy1 * vx0)[:, None, :]
            + gather(y1i, x1i) * (wy1 * wx1 * vy1 * vx1)[:, None, :])


def seg_loss_ref(pred1, pred2, seg1, seg2, disp, *, lambda_super, lambda_ana):
    B, C, H, W = pred1.shape
    HW = H * W
    rs = lambda x: x.reshape(x.shape[0], x.shape[1], HW).astype(jnp.float32)
    p1, p2 = rs(pred1), rs(pred2)
    if seg1 is not None and seg2 is not None:
        s1, s2 = rs(seg1), rs(seg2)
        loss_super = _dice_mean_ref(p1, s1) + _dice_mean_ref(p2, s2)
    elif seg1 is not None:
        s1, s2 = rs(seg1), p2
        loss_super = _dice_mean_ref(p1, s1)
    else:
        s1, s2 = p1, rs(seg2)
        loss_super = _dice_mean_ref(p2, s2)
    warped = _warp_ref(s2, disp.reshape(B, 2, HW).astype(jnp.float32), H, W)
    loss_ana = _dice_mean_ref(warped, s1)
    return lambda_super * loss_super + lambda_ana * loss_ana


if __name__ == "__main__":
    key = jax.random.PRNGKey(0)
    k1, k2, k3, k4, k5 = jax.random.split(key, 5)
    B, C, H, W = 2, 4, 16, 16

    pred1 = jax.nn.softmax(jax.random.normal(k1, (B, C, H, W), jnp.float32), axis=1)
    pred2 = jax.nn.softmax(jax.random.normal(k2, (B, C, H, W), jnp.float32), axis=1)
    seg1 = jax.nn.one_hot(jax.random.randint(k3, (B, H, W), 0, C), C, axis=1).astype(jnp.float32)
    seg2 = jax.nn.one_hot(jax.random.randint(k4, (B, H, W), 0, C), C, axis=1).astype(jnp.float32)
    disp = 2.0 * jax.random.normal(k5, (B, 2, H, W), jnp.float32)

    lambda_super, lambda_ana = 1.0, 0.5

    loss = jax.block_until_ready(
        seg_loss(pred1, pred2, seg1, seg2, disp,
                 lambda_super=lambda_super, lambda_ana=lambda_ana))
    ref = jax.block_until_ready(
        seg_loss_ref(pred1, pred2, seg1, seg2, disp,
                     lambda_super=lambda_super, lambda_ana=lambda_ana))

    # Kernel inputs are bf16 (deliberate, halves HBM traffic); reference is f32.
    assert jnp.abs(loss - ref) < 1e-2, (loss, ref)
    print("KERNEL_OK")
</pallas_src>

<mosaic_0001>
module attributes {stable_mosaic.version = 11 : i64} {
  func.func @_dice_partials_kernel(%arg0: i32, %arg1: i32, %arg2: memref<1x9x256xbf16, #tpu.memory_space<vmem>>, %arg3: memref<1x9x256xbf16, #tpu.memory_space<vmem>>, %arg4: memref<1x3x9xf32, #tpu.memory_space<vmem>>) attributes {dimension_semantics = [#tpu.dimension_semantics<parallel>, #tpu.dimension_semantics<arbitrary>], iteration_bounds = array<i64: 2, 1>, scalar_prefetch = 0 : i64, scratch_operands = 0 : i64, tpu.core_type = #tpu.core_type<tc>, window_params = [{transform_indices = @transform_0, window_bounds = array<i64: 1, 9, 256>}, {transform_indices = @transform_1, window_bounds = array<i64: 1, 9, 256>}, {transform_indices = @transform_2, window_bounds = array<i64: 1, 3, 9>}]} {
    %c0_i32 = arith.constant 0 : i32
    %0 = arith.cmpi eq, %arg1, %c0_i32 : i32
    %1 = arith.extui %0 : i1 to i32
    %c0_i32_0 = arith.constant 0 : i32
    %2 = arith.cmpi ne, %1, %c0_i32_0 : i32
    scf.if %2 {
      %cst_24 = arith.constant 0.000000e+00 : f32
      %23 = vector.broadcast %cst_24 : f32 to vector<1x3x9xf32>
      %c0_25 = arith.constant 0 : index
      %c0_26 = arith.constant 0 : index
      %c0_27 = arith.constant 0 : index
      %24 = vector.load %arg4[%c0_25, %c0_26, %c0_27] : memref<1x3x9xf32, #tpu.memory_space<vmem>>, vector<1x3x9xf32>
      tpu.vector_store %arg4[%c0_25, %c0_26, %c0_27], %23 {strides = array<i32>} : memref<1x3x9xf32, #tpu.memory_space<vmem>>, vector<1x3x9xf32>,
    } else {
    }
    %c0 = arith.constant 0 : index
    %c0_1 = arith.constant 0 : index
    %c0_2 = arith.constant 0 : index
    %3 = vector.load %arg2[%c0, %c0_1, %c0_2] : memref<1x9x256xbf16, #tpu.memory_space<vmem>>, vector<1x9x256xbf16>
    %4 = arith.extf %3 : vector<1x9x256xbf16> to vector<1x9x256xf32>
    %c0_3 = arith.constant 0 : index
    %c0_4 = arith.constant 0 : index
    %c0_5 = arith.constant 0 : index
    %5 = vector.load %arg3[%c0_3, %c0_4, %c0_5] : memref<1x9x256xbf16, #tpu.memory_space<vmem>>, vector<1x9x256xbf16>
    %6 = arith.extf %5 : vector<1x9x256xbf16> to vector<1x9x256xf32>
    %7 = arith.mulf %4, %6 : vector<1x9x256xf32>
    %cst = arith.constant dense<0.000000e+00> : vector<1x9xf32>
    %8 = vector.multi_reduction <add>, %7, %cst [2] : vector<1x9x256xf32> to vector<1x9xf32>
    %9 = vector.shape_cast %8 : vector<1x9xf32> to vector<1x1x9xf32>
    %cst_6 = arith.constant dense<0.000000e+00> : vector<1x9xf32>
    %10 = vector.multi_reduction <add>, %4, %cst_6 [2] : vector<1x9x256xf32> to vector<1x9xf32>
    %11 = vector.shape_cast %10 : vector<1x9xf32> to vector<1x1x9xf32>
    %cst_7 = arith.constant dense<0.000000e+00> : vector<1x9xf32>
    %12 = vector.multi_reduction <add>, %6, %cst_7 [2] : vector<1x9x256xf32> to vector<1x9xf32>
    %13 = vector.shape_cast %12 : vector<1x9xf32> to vector<1x1x9xf32>
    %c0_8 = arith.constant 0 : index
    %c0_9 = arith.constant 0 : index
    %c0_10 = arith.constant 0 : index
    %14 = vector.load %arg4[%c0_8, %c0_9, %c0_10] : memref<1x3x9xf32, #tpu.memory_space<vmem>>, vector<1x1x9xf32>
    %15 = arith.addf %14, %9 : vector<1x1x9xf32>
    %c0_11 = arith.constant 0 : index
    %c0_12 = arith.constant 0 : index
    %c0_13 = arith.constant 0 : index
    %16 = vector.load %arg4[%c0_11, %c0_12, %c0_13] : memref<1x3x9xf32, #tpu.memory_space<vmem>>, vector<1x1x9xf32>
    tpu.vector_store %arg4[%c0_11, %c0_12, %c0_13], %15 {strides = array<i32>} : memref<1x3x9xf32, #tpu.memory_space<vmem>>, vector<1x1x9xf32>,
    %c0_14 = arith.constant 0 : index
    %c1 = arith.constant 1 : index
    %c0_15 = arith.constant 0 : index
    %17 = vector.load %arg4[%c0_14, %c1, %c0_15] : memref<1x3x9xf32, #tpu.memory_space<vmem>>, vector<1x1x9xf32>
    %18 = arith.addf %17, %11 : vector<1x1x9xf32>
    %c0_16 = arith.constant 0 : index
    %c1_17 = arith.constant 1 : index
    %c0_18 = arith.constant 0 : index
    %19 = vector.load %arg4[%c0_16, %c1_17, %c0_18] : memref<1x3x9xf32, #tpu.memory_space<vmem>>, vector<1x1x9xf32>
    tpu.vector_store %arg4[%c0_16, %c1_17, %c0_18], %18 {strides = array<i32>} : memref<1x3x9xf32, #tpu.memory_space<vmem>>, vector<1x1x9xf32>,
    %c0_19 = arith.constant 0 : index
    %c2 = arith.constant 2 : index
    %c0_20 = arith.constant 0 : index
    %20 = vector.load %arg4[%c0_19, %c2, %c0_20] : memref<1x3x9xf32, #tpu.memory_space<vmem>>, vector<1x1x9xf32>
    %21 = arith.addf %20, %13 : vector<1x1x9xf32>
    %c0_21 = arith.constant 0 : index
    %c2_22 = arith.constant 2 : index
    %c0_23 = arith.constant 0 : index
    %22 = vector.load %arg4[%c0_21, %c2_22, %c0_23] : memref<1x3x9xf32, #tpu.memory_space<vmem>>, vector<1x1x9xf32>
    tpu.vector_store %arg4[%c0_21, %c2_22, %c0_23], %21 {strides = array<i32>} : memref<1x3x9xf32, #tpu.memory_space<vmem>>, vector<1x1x9xf32>,
    return
  }
  func.func @transform_0(%arg0: i32, %arg1: i32) -> (i32, i32, i32) {
    %c0_i32 = arith.constant 0 : i32
    %c0_i32_0 = arith.constant 0 : i32
    return %arg0, %c0_i32, %arg1 : i32, i32, i32
  }
  func.func @transform_1(%arg0: i32, %arg1: i32) -> (i32, i32, i32) {
    %c0_i32 = arith.constant 0 : i32
    %c0_i32_0 = arith.constant 0 : i32
    return %arg0, %c0_i32, %arg1 : i32, i32, i32
  }
  func.func @transform_2(%arg0: i32, %arg1: i32) -> (i32, i32, i32) {
    %c0_i32 = arith.constant 0 : i32
    %c0_i32_0 = arith.constant 0 : i32
    %c0_i32_1 = arith.constant 0 : i32
    return %arg0, %c0_i32, %c0_i32_0 : i32, i32, i32
  }
}

</mosaic_0001>

<bundles_post_ra>
// kernel: tpu_custom_call.1
= control target key start
LH: loop header
LB: loop body
LE: loop exit
PB: predicated region body
PF: predicated region fallthrough
CT: control target
= control target key end

     0   :  { %s467_s9 = smov 0   ;;  %s469_s10 = smov 0   ;;  %s524_s0 = inlined_call_operand.vmem [shape: bf16[2,9,256], index: 0, kind: input, shape index: {}]   ;;  %s525_s1 = inlined_call_operand.vmem [shape: bf16[2,9,256], index: 1, kind: input, shape index: {}]   ;;  %s526_s2 = inlined_call_operand.vmem [shape: f32[2,3,9], index: 2, kind: output, shape index: {}]  }
   0x1   :  { %s471_s11 = smov 0  }
   0x2 LB: > { %s24_s12 = sadd.s32 1, %s445_s10  ;;  %p392_p0 = scmp.ge.s32.totalorder %s449_s11, 1  ;;  %s449_s11 = sphi %s471_s11, %s12_s11   ;;  %s445_s10 = sphi %s469_s10, %s528_s10   ;;  %s441_s9 = sphi %s467_s9, %s527_s9  }
   0x3   : > { %p26_p1 = scmp.ge.s32.totalorder %s24_s12, 2  ;;  %p148_p2 = scmp.lt.s32.totalorder %s449_s11, 3 }
   0x5   : > { %s530_s12 = smov (%p26_p1, %s24_s12), 0  ;;  %p149_p3 = pnand %p392_p0, %p148_p2 }
   0x6   : > { %p183_p4 = scmp.lt.s32.totalorder (!%p149_p3), %s441_s9, 1  ;;  %vm210_vm0 = vcmask (!%p149_p3), 67584   ;;  %v451_v0 = vmov (!%p149_p3), 0.0   ;;  %vm231_vm1 = vcmask (!%p149_p3), 1040384   ;;  %v256_v29 = vlaneseq (!%p149_p3) }
   0x7   : > { %152 = sbr.rel (%p149_p3) target bundleno = 181 (0xb5), region = 28  ;;  %vm267_vm2 = vcmask (!%p149_p3), 130112   ;;  %vm271_vm3 = vcmask (!%p149_p3), 65536  }
   0x8   : > { %v257_v30 = vand.u32 (!%p149_p3), 127, %v256_v29  ;;  %v259_v31 = vshrl.u32 (!%p149_p3), %v256_v29, 7 }
   0xa   : > { %v262_v32 = vadd.s32 (!%p149_p3), 4294967288, %v257_v30  ;;  %v260_v34 = vsub.s32 (!%p149_p3), %v257_v30, %v259_v31 }
   0xc   : > { %v265_v35 = vsub.s32 (!%p149_p3), %v262_v32, %v259_v31 }
   0xe   : > { %s532_s9 = smov (!%p183_p4, %s441_s9), 1 }
   0xf   : > { %s400_s13 = sshll.u32 %s532_s9, 4  ;;  %s397_s14 = sshll.u32 %s532_s9, 2 }
  0x10   : > { %s190_s17 = scalar_lea.vmem %s524_s0, %s400_s13  ;;  %s491_s20 = scalar_lea.vmem %s526_s2, %s397_s14 }
  0x11   : > { %211 = vst.msk [vmem:[%s491_s20] sm:$0x7] %vm210_vm0, %v451_v0  ;;  %v212_v1 = vld [vmem:[%s190_s17] sm:$0xff]  ;;  %v213_v2 = vld [vmem:[%s190_s17 + $0x8] sm:$0x11]  ;;  %s200_s23 = scalar_lea.vmem %s525_s1, %s400_s13 }
  0x12   : > { %v214_v3 = vunpack.c.l.bf16 %v212_v1  ;;  %v215_v4 = vunpack.c.h.bf16 %v212_v1  ;;  %v218_v5 = vld [vmem:[%s200_s23] sm:$0xff]  ;;  %v219_v6 = vld [vmem:[%s200_s23 + $0x8] sm:$0x11]  ;;  %v216_v7 = vunpack.c.l.bf16 %v213_v2  ;;  %v217_v8 = vunpack.c.h.bf16 %v213_v2 }
  0x13   : > { %v220_v9 = vunpack.c.l.bf16 %v218_v5  ;;  %v221_v10 = vunpack.c.h.bf16 %v218_v5  ;;  %v222_v11 = vunpack.c.l.bf16 %v219_v6  ;;  %v223_v12 = vunpack.c.h.bf16 %v219_v6 }
  0x14   : > { %v237_v13 = vadd.f32 %v215_v4, %v214_v3  ;;  %v240_v14 = vsel %vm231_vm1, %v216_v7, 0.0  ;;  %v241_v15 = vsel %vm231_vm1, %v217_v8, 0.0 }
  0x15   : > { %v224_v16 = vmul.f32 %v220_v9, %v214_v3  ;;  %v225_v17 = vmul.f32 %v221_v10, %v215_v4  ;;  %v226_v18 = vmul.f32 %v222_v11, %v216_v7  ;;  %v242_v19 = vadd.f32 %v241_v15, %v240_v14 }
  0x16   : > { %238 = vadd.xlane.f32.xlu1 %v237_v13  ;;  %v227_v20 = vmul.f32 %v223_v12, %v217_v8  ;;  %v248_v23 = vsel %vm231_vm1, %v222_v11, 0.0  ;;  %v249_v24 = vsel %vm231_vm1, %v223_v12, 0.0  ;;  %v245_v28 = vadd.f32 %v221_v10, %v220_v9 }
  0x17   : > { %v228_v21 = vadd.f32 %v225_v17, %v224_v16  ;;  %v232_v22 = vsel %vm231_vm1, %v226_v18, 0.0  ;;  %v250_v27 = vadd.f32 %v249_v24, %v248_v23 }
  0x18   : > { %v233_v25 = vsel %vm231_vm1, %v227_v20, 0.0  ;;  %v273_v39 = vld [vmem:[%s491_s20 + $0x1] sm:$0x1]  ;;  %v253_v45 = vld [vmem:[%s491_s20] sm:$0x1] }
  0x19   : > { %229 = vadd.xlane.f32.xlu0 %v228_v21  ;;  %v234_v26 = vadd.f32 %v233_v25, %v232_v22  ;;  %v288_v52 = vld [vmem:[%s491_s20 + $0x2] sm:$0x1] }
  0x1a   : > { %243 = vadd.xlane.f32.xlu1 %v242_v19 }
  0x1d   : > { %235 = vadd.xlane.f32.xlu0 %v234_v26 }
  0x1e   : > { %251 = vadd.xlane.f32.xlu1 %v250_v27 }
  0x21   : > { %246 = vadd.xlane.f32.xlu0 %v245_v28 }
  0xa3   : > { %v239_v33 = vpop.xlane.xlu1 %238 }
  0xa4   : > { %v279_v38 = vrot.slane %v239_v33, %v260_v34 }
  0xa6   : > { %v230_v36 = vpop.xlane.xlu0 %229 }
  0xa7   : > { %v244_v37 = vpop.xlane.xlu1 %243  ;;  %v261_v43 = vrot.slane %v230_v36, %v260_v34 }
  0xa8   : > { %v283_v40 = vrot.slane %v244_v37, %v265_v35 }
  0xaa   : > { %v284_v41 = vsel %vm267_vm2, %v283_v40, %v279_v38  ;;  %v236_v42 = vpop.xlane.xlu0 %235 }
  0xab   : > { %v286_v44 = vadd.f32 %v284_v41, %v273_v39  ;;  %v266_v46 = vrot.slane %v236_v42, %v265_v35  ;;  %v252_v47 = vpop.xlane.xlu1 %251 }
  0xac   : > { %v298_v49 = vrot.slane %v252_v47, %v265_v35 }
  0xad   : > { %287 = vst.msk [vmem:[%s491_s20 + $0x1] sm:$0x1] %vm271_vm3, %v286_v44  ;;  %v268_v48 = vsel %vm267_vm2, %v266_v46, %v261_v43 }
  0xae   : > { %v270_v50 = vadd.f32 %v268_v48, %v253_v45  ;;  %v247_v51 = vpop.xlane.xlu0 %246 }
  0xaf   : > { %v294_v53 = vrot.slane %v247_v51, %v260_v34 }
  0xb0   : > { %272 = vst.msk [vmem:[%s491_s20] sm:$0x1] %vm271_vm3, %v270_v50 }
  0xb1   : > { %v299_v54 = vsel %vm267_vm2, %v298_v49, %v294_v53 }
  0xb2   : > { %v301_v55 = vadd.f32 %v299_v54, %v288_v52 }
  0xb4   : > { %302 = vst.msk [vmem:[%s491_s20 + $0x2] sm:$0x1] %vm271_vm3, %v301_v55 }
  0xb5 PF: > { %s12_s11 = sadd.s32 1, %s449_s11   ;;  %s527_s9 = smov %s445_s10 }
  0xb6   : > { %p9_p5 = scmp.ge.s32.totalorder %s12_s11, 4   ;;  %s528_s10 = smov %s530_s12 }
  0xb8   :  { %11 = sbr.rel (!%p9_p5) target bundleno = 2 (0x2), region = 65 }

</bundles_post_ra>
